<compile_context>
chip_gen: v7x
topology: tpu7x:2x2x1
jax: 0.10.0
libtpu: 0.0.40
codegen_flags: <defaults>
</compile_context>

<pallas_src>
import functools

import jax
import jax.numpy as jnp
from jax import lax
from jax.experimental import pallas as pl
from jax.experimental.pallas import tpu as pltpu


def _round_up(x, m):
    return ((x + m - 1) // m) * m


def lstm_linear_kernel(x_ref, wih_ref, whh_ref, b_ref, wlin_ref, blin_ref,
                       y_ref, out_ref,
                       gx_sc, hseq_sc, h_sc, c_sc,
                       *, chunk, batch_p, hidden, unroll):
    Bp = batch_p
    H = hidden

    # ---- First chunk only: zero-init the carried recurrent state.
    @pl.when(pl.program_id(0) == 0)
    def _():
        h_sc[...] = jnp.zeros_like(h_sc)
        c_sc[...] = jnp.zeros_like(c_sc)

    # ---- Prologue (per chunk): hoisted input projection over all timesteps
    #      of this chunk.  bf16 MXU operands, f32 accumulation, f32 bias.
    gx_sc[...] = (jnp.dot(x_ref[...].astype(jnp.bfloat16), wih_ref[...],
                          preferred_element_type=jnp.float32)
                  + b_ref[...])

    whh = whh_ref[...]            # (H, 4H) bf16, resident across the recurrence

    def step(t, carry):
        h, c = carry
        r0 = pl.multiple_of(t * Bp, Bp)          # Bp is a multiple of 8: aligned
        gates = gx_sc[pl.ds(r0, Bp), :] + jnp.dot(
            h.astype(jnp.bfloat16), whh, preferred_element_type=jnp.float32)
        # Gate rows were pre-permuted to (i, f, o, g): one contiguous sigmoid
        # over the first 3H lanes, one tanh over the last H lanes.
        s = jax.nn.sigmoid(gates[:, :3 * H])
        i_g = s[:, 0 * H:1 * H]
        f_g = s[:, 1 * H:2 * H]
        o_g = s[:, 2 * H:3 * H]
        g_g = jnp.tanh(gates[:, 3 * H:])
        c_new = f_g * c + i_g * g_g
        h_new = o_g * jnp.tanh(c_new)
        hseq_sc[pl.ds(r0, Bp), :] = h_new        # dense, aligned f32 store
        return h_new, c_new

    h_fin, c_fin = lax.fori_loop(0, chunk, step, (h_sc[...], c_sc[...]),
                                 unroll=unroll)
    h_sc[...] = h_fin                            # carry to the next chunk
    c_sc[...] = c_fin

    # ---- Epilogue (per chunk): dense h writeback + hoisted Linear head fed
    #      from full-precision (f32) hidden states.
    h_all = hseq_sc[...]                         # (chunk*Bp, H) f32
    out_ref[...] = h_all.astype(out_ref.dtype)
    y = (jnp.dot(h_all.astype(jnp.bfloat16), wlin_ref[...],
                 preferred_element_type=jnp.float32)
         + blin_ref[...])
    y_ref[...] = y.astype(y_ref.dtype)


def prepare_params(w_ih, w_hh, b_ih, b_hh, w_lin, b_lin):
    """One-time parameter prep (call at load time, not per forward call).

    * Gate rows permuted from PyTorch (i, f, g, o) to (i, f, o, g) so the kernel
      applies one contiguous sigmoid (3H lanes) and one tanh (H lanes).
    * Weights transposed to right-multiply layout and cast to bf16 for the MXU.
    * LSTM biases pre-summed, kept f32.
    """
    H = w_hh.shape[1]
    O = w_lin.shape[0]

    def reorder(w):
        return jnp.concatenate([w[0:2 * H], w[3 * H:4 * H], w[2 * H:3 * H]],
                               axis=0)

    wih_t = jnp.transpose(reorder(w_ih)).astype(jnp.bfloat16)   # (D_in, 4H)
    whh_t = jnp.transpose(reorder(w_hh)).astype(jnp.bfloat16)   # (H, 4H)
    b = reorder(b_ih + b_hh).reshape(1, 4 * H).astype(jnp.float32)
    wlin_t = jnp.transpose(w_lin).astype(jnp.bfloat16)          # (H, O)
    blin = b_lin.reshape(1, O).astype(jnp.float32)
    return wih_t, whh_t, b, wlin_t, blin


def net_forward(x, params, *, chunk=4):
    """x: (S, B, D_in) f32.  Returns (y, out) matching the PyTorch module."""
    wih_t, whh_t, b, wlin_t, blin = params
    S, B, D_in = x.shape
    H = whh_t.shape[0]
    O = wlin_t.shape[1]

    # Largest chunk <= requested that divides S.
    chunk = max(1, min(chunk, S))
    while S % chunk:
        chunk -= 1
    n_chunks = S // chunk

    # Pad batch to a sublane multiple (8): every per-timestep slice inside the
    # kernel is then (8,128)-tile aligned.  Padded rows are discarded below.
    Bp = _round_up(B, 8)
    if Bp != B:
        x = jnp.pad(x, ((0, 0), (0, Bp - B), (0, 0)))
    x2d = x.reshape(S * Bp, D_in)                    # free row-major reshape

    unroll = chunk if chunk <= 8 else 4
    kernel = functools.partial(lstm_linear_kernel, chunk=chunk, batch_p=Bp,
                               hidden=H, unroll=unroll)

    rows = chunk * Bp
    y2d, out2d = pl.pallas_call(
        kernel,
        out_shape=(
            jax.ShapeDtypeStruct((S * Bp, O), x.dtype),
            jax.ShapeDtypeStruct((S * Bp, H), x.dtype),
        ),
        grid_spec=pltpu.PrefetchScalarGridSpec(
            num_scalar_prefetch=0,
            grid=(n_chunks,),
            in_specs=[
                pl.BlockSpec((rows, D_in), lambda c: (c, 0)),    # x chunk
                pl.BlockSpec((D_in, 4 * H), lambda c: (0, 0)),   # W_ih^T (bf16)
                pl.BlockSpec((H, 4 * H), lambda c: (0, 0)),      # W_hh^T (bf16)
                pl.BlockSpec((1, 4 * H), lambda c: (0, 0)),      # LSTM bias (f32)
                pl.BlockSpec((H, O), lambda c: (0, 0)),          # W_lin^T (bf16)
                pl.BlockSpec((1, O), lambda c: (0, 0)),          # b_lin (f32)
            ],
            out_specs=[
                pl.BlockSpec((rows, O), lambda c: (c, 0)),       # y chunk
                pl.BlockSpec((rows, H), lambda c: (c, 0)),       # out (h_t) chunk
            ],
            scratch_shapes=[
                pltpu.VMEM((rows, 4 * H), jnp.float32),          # gx (this chunk)
                pltpu.VMEM((rows, H), jnp.float32),              # h seq (f32)
                pltpu.VMEM((Bp, H), jnp.float32),                # carried h
                pltpu.VMEM((Bp, H), jnp.float32),                # carried c
            ],
        ),
        compiler_params=pltpu.CompilerParams(
            # Recurrence is sequential across chunks (h/c carried in scratch).
            dimension_semantics=("arbitrary",),
            vmem_limit_bytes=32 * 1024 * 1024,
        ),
    )(x2d, wih_t, whh_t, b, wlin_t, blin)

    y = y2d.reshape(S, Bp, O)[:, :B, :]
    out = out2d.reshape(S, Bp, H)[:, :B, :]
    return y, out


def reference_forward(x, w_ih, w_hh, b_ih, b_hh, w_lin, b_lin):
    """Pure-JAX f32 reference of nn.LSTM + nn.Linear."""
    S, B, D_in = x.shape
    H = w_hh.shape[1]

    def step(carry, x_t):
        h, c = carry
        gates = x_t @ w_ih.T + b_ih + h @ w_hh.T + b_hh
        i = jax.nn.sigmoid(gates[:, 0 * H:1 * H])
        f = jax.nn.sigmoid(gates[:, 1 * H:2 * H])
        g = jnp.tanh(gates[:, 2 * H:3 * H])
        o = jax.nn.sigmoid(gates[:, 3 * H:4 * H])
        c_new = f * c + i * g
        h_new = o * jnp.tanh(c_new)
        return (h_new, c_new), h_new

    h0 = jnp.zeros((B, H), x.dtype)
    c0 = jnp.zeros((B, H), x.dtype)
    _, out = jax.lax.scan(step, (h0, c0), x)
    y = out @ w_lin.T + b_lin
    return y, out


if __name__ == "__main__":
    # Small shapes consistent with the module: seq=8, batch=4,
    # input_size=16, hidden_size=32, output_size=8.
    S, B, D_in, H, O = 8, 4, 16, 32, 8

    key = jax.random.PRNGKey(0)
    ks = jax.random.split(key, 7)
    scale = 1.0 / jnp.sqrt(H)  # PyTorch-style uniform(-1/sqrt(H), 1/sqrt(H))

    x = jax.random.normal(ks[0], (S, B, D_in), dtype=jnp.float32)
    w_ih = jax.random.uniform(ks[1], (4 * H, D_in), minval=-scale, maxval=scale)
    w_hh = jax.random.uniform(ks[2], (4 * H, H), minval=-scale, maxval=scale)
    b_ih = jax.random.uniform(ks[3], (4 * H,), minval=-scale, maxval=scale)
    b_hh = jax.random.uniform(ks[4], (4 * H,), minval=-scale, maxval=scale)
    w_lin = jax.random.uniform(ks[5], (O, H), minval=-scale, maxval=scale)
    b_lin = jax.random.uniform(ks[6], (O,), minval=-scale, maxval=scale)

    params = prepare_params(w_ih, w_hh, b_ih, b_hh, w_lin, b_lin)
    y, out = net_forward(x, params, chunk=4)   # chunk=4 -> 2 grid steps, carry tested
    jax.block_until_ready((y, out))

    y_r, out_r = reference_forward(x, w_ih, w_hh, b_ih, b_hh, w_lin, b_lin)
    # bf16 MXU operands (f32 accumulation) -> compare at bf16-appropriate tolerance.
    assert jnp.allclose(y, y_r, atol=2e-2, rtol=2e-2), \
        f"y mismatch, max err {jnp.max(jnp.abs(y - y_r))}"
    assert jnp.allclose(out, out_r, atol=2e-2, rtol=2e-2), \
        f"out mismatch, max err {jnp.max(jnp.abs(out - out_r))}"

    print("KERNEL_OK")
</pallas_src>

<mosaic_0001>
module attributes {stable_mosaic.version = 11 : i64} {
  func.func @lstm_linear_kernel(%arg0: i32, %arg1: memref<32x16xf32, #tpu.memory_space<vmem>>, %arg2: memref<16x128xbf16, #tpu.memory_space<vmem>>, %arg3: memref<32x128xbf16, #tpu.memory_space<vmem>>, %arg4: memref<1x128xf32, #tpu.memory_space<vmem>>, %arg5: memref<32x8xbf16, #tpu.memory_space<vmem>>, %arg6: memref<1x8xf32, #tpu.memory_space<vmem>>, %arg7: memref<32x8xf32, #tpu.memory_space<vmem>>, %arg8: memref<32x32xf32, #tpu.memory_space<vmem>>, %arg9: memref<32x128xf32, #tpu.memory_space<vmem>>, %arg10: memref<32x32xf32, #tpu.memory_space<vmem>>, %arg11: memref<8x32xf32, #tpu.memory_space<vmem>>, %arg12: memref<8x32xf32, #tpu.memory_space<vmem>>) attributes {dimension_semantics = [#tpu.dimension_semantics<arbitrary>], iteration_bounds = array<i64: 2>, scalar_prefetch = 0 : i64, scratch_operands = 4 : i64, tpu.core_type = #tpu.core_type<tc>, window_params = [{transform_indices = @transform_0, window_bounds = array<i64: 32, 16>}, {pipeline_mode = #tpu.pipeline_mode<synchronous>, transform_indices = @transform_1, window_bounds = array<i64: 16, 128>}, {pipeline_mode = #tpu.pipeline_mode<synchronous>, transform_indices = @transform_2, window_bounds = array<i64: 32, 128>}, {pipeline_mode = #tpu.pipeline_mode<synchronous>, transform_indices = @transform_3, window_bounds = array<i64: 1, 128>}, {pipeline_mode = #tpu.pipeline_mode<synchronous>, transform_indices = @transform_4, window_bounds = array<i64: 32, 8>}, {pipeline_mode = #tpu.pipeline_mode<synchronous>, transform_indices = @transform_5, window_bounds = array<i64: 1, 8>}, {transform_indices = @transform_6, window_bounds = array<i64: 32, 8>}, {transform_indices = @transform_7, window_bounds = array<i64: 32, 32>}]} {
    %c0_i32 = arith.constant 0 : i32
    %0 = arith.cmpi eq, %arg0, %c0_i32 : i32
    %1 = arith.extui %0 : i1 to i32
    %c0_i32_0 = arith.constant 0 : i32
    %2 = arith.cmpi ne, %1, %c0_i32_0 : i32
    scf.if %2 {
      %cst_49 = arith.constant 0.000000e+00 : f32
      %125 = vector.broadcast %cst_49 : f32 to vector<8x32xf32>
      %c0_50 = arith.constant 0 : index
      %c0_51 = arith.constant 0 : index
      %126 = vector.load %arg11[%c0_50, %c0_51] : memref<8x32xf32, #tpu.memory_space<vmem>>, vector<8x32xf32>
      tpu.vector_store %arg11[%c0_50, %c0_51], %125 {strides = array<i32>} : memref<8x32xf32, #tpu.memory_space<vmem>>, vector<8x32xf32>,
      %cst_52 = arith.constant 0.000000e+00 : f32
      %127 = vector.broadcast %cst_52 : f32 to vector<8x32xf32>
      %c0_53 = arith.constant 0 : index
      %c0_54 = arith.constant 0 : index
      %128 = vector.load %arg12[%c0_53, %c0_54] : memref<8x32xf32, #tpu.memory_space<vmem>>, vector<8x32xf32>
      tpu.vector_store %arg12[%c0_53, %c0_54], %127 {strides = array<i32>} : memref<8x32xf32, #tpu.memory_space<vmem>>, vector<8x32xf32>,
    } else {
    }
    %c0 = arith.constant 0 : index
    %c0_1 = arith.constant 0 : index
    %3 = vector.load %arg1[%c0, %c0_1] : memref<32x16xf32, #tpu.memory_space<vmem>>, vector<32x16xf32>
    %4 = arith.truncf %3 : vector<32x16xf32> to vector<32x16xbf16>
    %c0_2 = arith.constant 0 : index
    %c0_3 = arith.constant 0 : index
    %5 = vector.load %arg2[%c0_2, %c0_3] : memref<16x128xbf16, #tpu.memory_space<vmem>>, vector<16x128xbf16>
    %cst = arith.constant dense<0.000000e+00> : vector<32x128xf32>
    %6 = tpu.matmul %4, %5, %cst {dimension_numbers = #tpu.dot_dimension_numbers<[1], [0], [0], [1], [0, 0, 1, 1], [], []>} : vector<32x16xbf16>, vector<16x128xbf16>, vector<32x128xf32> -> vector<32x128xf32>
    %c0_4 = arith.constant 0 : index
    %c0_5 = arith.constant 0 : index
    %7 = vector.load %arg4[%c0_4, %c0_5] : memref<1x128xf32, #tpu.memory_space<vmem>>, vector<1x128xf32>
    %8 = vector.broadcast %7 : vector<1x128xf32> to vector<32x128xf32>
    %9 = arith.addf %6, %8 : vector<32x128xf32>
    %c0_6 = arith.constant 0 : index
    %c0_7 = arith.constant 0 : index
    %10 = vector.load %arg9[%c0_6, %c0_7] : memref<32x128xf32, #tpu.memory_space<vmem>>, vector<32x128xf32>
    tpu.vector_store %arg9[%c0_6, %c0_7], %9 {strides = array<i32>} : memref<32x128xf32, #tpu.memory_space<vmem>>, vector<32x128xf32>,
    %c0_8 = arith.constant 0 : index
    %c0_9 = arith.constant 0 : index
    %11 = vector.load %arg3[%c0_8, %c0_9] : memref<32x128xbf16, #tpu.memory_space<vmem>>, vector<32x128xbf16>
    %c0_10 = arith.constant 0 : index
    %c0_11 = arith.constant 0 : index
    %12 = vector.load %arg11[%c0_10, %c0_11] : memref<8x32xf32, #tpu.memory_space<vmem>>, vector<8x32xf32>
    %c0_12 = arith.constant 0 : index
    %c0_13 = arith.constant 0 : index
    %13 = vector.load %arg12[%c0_12, %c0_13] : memref<8x32xf32, #tpu.memory_space<vmem>>, vector<8x32xf32>
    %c0_i32_14 = arith.constant 0 : i32
    %c8_i32 = arith.constant 8 : i32
    %14 = arith.muli %c0_i32_14, %c8_i32 : i32
    %15 = tpu.assume_multiple %14, 8 : i32
    %16 = arith.index_cast %15 : i32 to index
    %c0_15 = arith.constant 0 : index
    %17 = vector.load %arg9[%16, %c0_15] : memref<32x128xf32, #tpu.memory_space<vmem>>, vector<8x128xf32>
    %18 = arith.truncf %12 : vector<8x32xf32> to vector<8x32xbf16>
    %cst_16 = arith.constant dense<0.000000e+00> : vector<8x128xf32>
    %19 = tpu.matmul %18, %11, %cst_16 {dimension_numbers = #tpu.dot_dimension_numbers<[1], [0], [0], [1], [0, 0, 1, 1], [], []>} : vector<8x32xbf16>, vector<32x128xbf16>, vector<8x128xf32> -> vector<8x128xf32>
    %20 = arith.addf %17, %19 : vector<8x128xf32>
    %21 = vector.extract_strided_slice %20 {offsets = [0, 0], sizes = [8, 96], strides = [1, 1]} : vector<8x128xf32> to vector<8x96xf32>
    %22 = arith.negf %21 : vector<8x96xf32>
    %23 = math.exp %22 : vector<8x96xf32>
    %cst_17 = arith.constant 1.000000e+00 : f32
    %24 = vector.broadcast %cst_17 : f32 to vector<8x96xf32>
    %25 = arith.addf %24, %23 : vector<8x96xf32>
    %26 = arith.divf %24, %25 : vector<8x96xf32>
    %27 = vector.extract_strided_slice %26 {offsets = [0, 0], sizes = [8, 32], strides = [1, 1]} : vector<8x96xf32> to vector<8x32xf32>
    %28 = vector.extract_strided_slice %26 {offsets = [0, 32], sizes = [8, 32], strides = [1, 1]} : vector<8x96xf32> to vector<8x32xf32>
    %29 = vector.extract_strided_slice %26 {offsets = [0, 64], sizes = [8, 32], strides = [1, 1]} : vector<8x96xf32> to vector<8x32xf32>
    %30 = vector.extract_strided_slice %20 {offsets = [0, 96], sizes = [8, 32], strides = [1, 1]} : vector<8x128xf32> to vector<8x32xf32>
    %31 = math.tanh %30 : vector<8x32xf32>
    %32 = arith.mulf %28, %13 : vector<8x32xf32>
    %33 = arith.mulf %27, %31 : vector<8x32xf32>
    %34 = arith.addf %32, %33 : vector<8x32xf32>
    %35 = math.tanh %34 : vector<8x32xf32>
    %36 = arith.mulf %29, %35 : vector<8x32xf32>
    %37 = arith.index_cast %15 : i32 to index
    %c0_18 = arith.constant 0 : index
    %38 = vector.load %arg10[%37, %c0_18] : memref<32x32xf32, #tpu.memory_space<vmem>>, vector<8x32xf32>
    tpu.vector_store %arg10[%37, %c0_18], %36 {strides = array<i32>} : memref<32x32xf32, #tpu.memory_space<vmem>>, vector<8x32xf32>,
    %c1_i32 = arith.constant 1 : i32
    %c8_i32_19 = arith.constant 8 : i32
    %39 = arith.muli %c1_i32, %c8_i32_19 : i32
    %40 = tpu.assume_multiple %39, 8 : i32
    %41 = arith.index_cast %40 : i32 to index
    %c0_20 = arith.constant 0 : index
    %42 = vector.load %arg9[%41, %c0_20] : memref<32x128xf32, #tpu.memory_space<vmem>>, vector<8x128xf32>
    %43 = arith.truncf %36 : vector<8x32xf32> to vector<8x32xbf16>
    %cst_21 = arith.constant dense<0.000000e+00> : vector<8x128xf32>
    %44 = tpu.matmul %43, %11, %cst_21 {dimension_numbers = #tpu.dot_dimension_numbers<[1], [0], [0], [1], [0, 0, 1, 1], [], []>} : vector<8x32xbf16>, vector<32x128xbf16>, vector<8x128xf32> -> vector<8x128xf32>
    %45 = arith.addf %42, %44 : vector<8x128xf32>
    %46 = vector.extract_strided_slice %45 {offsets = [0, 0], sizes = [8, 96], strides = [1, 1]} : vector<8x128xf32> to vector<8x96xf32>
    %47 = arith.negf %46 : vector<8x96xf32>
    %48 = math.exp %47 : vector<8x96xf32>
    %cst_22 = arith.constant 1.000000e+00 : f32
    %49 = vector.broadcast %cst_22 : f32 to vector<8x96xf32>
    %50 = arith.addf %49, %48 : vector<8x96xf32>
    %51 = arith.divf %49, %50 : vector<8x96xf32>
    %52 = vector.extract_strided_slice %51 {offsets = [0, 0], sizes = [8, 32], strides = [1, 1]} : vector<8x96xf32> to vector<8x32xf32>
    %53 = vector.extract_strided_slice %51 {offsets = [0, 32], sizes = [8, 32], strides = [1, 1]} : vector<8x96xf32> to vector<8x32xf32>
    %54 = vector.extract_strided_slice %51 {offsets = [0, 64], sizes = [8, 32], strides = [1, 1]} : vector<8x96xf32> to vector<8x32xf32>
    %55 = vector.extract_strided_slice %45 {offsets = [0, 96], sizes = [8, 32], strides = [1, 1]} : vector<8x128xf32> to vector<8x32xf32>
    %56 = math.tanh %55 : vector<8x32xf32>
    %57 = arith.mulf %53, %34 : vector<8x32xf32>
    %58 = arith.mulf %52, %56 : vector<8x32xf32>
    %59 = arith.addf %57, %58 : vector<8x32xf32>
    %60 = math.tanh %59 : vector<8x32xf32>
    %61 = arith.mulf %54, %60 : vector<8x32xf32>
    %62 = arith.index_cast %40 : i32 to index
    %c0_23 = arith.constant 0 : index
    %63 = vector.load %arg10[%62, %c0_23] : memref<32x32xf32, #tpu.memory_space<vmem>>, vector<8x32xf32>
    tpu.vector_store %arg10[%62, %c0_23], %61 {strides = array<i32>} : memref<32x32xf32, #tpu.memory_space<vmem>>, vector<8x32xf32>,
    %c2_i32 = arith.constant 2 : i32
    %c8_i32_24 = arith.constant 8 : i32
    %64 = arith.muli %c2_i32, %c8_i32_24 : i32
    %65 = tpu.assume_multiple %64, 8 : i32
    %66 = arith.index_cast %65 : i32 to index
    %c0_25 = arith.constant 0 : index
    %67 = vector.load %arg9[%66, %c0_25] : memref<32x128xf32, #tpu.memory_space<vmem>>, vector<8x128xf32>
    %68 = arith.truncf %61 : vector<8x32xf32> to vector<8x32xbf16>
    %cst_26 = arith.constant dense<0.000000e+00> : vector<8x128xf32>
    %69 = tpu.matmul %68, %11, %cst_26 {dimension_numbers = #tpu.dot_dimension_numbers<[1], [0], [0], [1], [0, 0, 1, 1], [], []>} : vector<8x32xbf16>, vector<32x128xbf16>, vector<8x128xf32> -> vector<8x128xf32>
    %70 = arith.addf %67, %69 : vector<8x128xf32>
    %71 = vector.extract_strided_slice %70 {offsets = [0, 0], sizes = [8, 96], strides = [1, 1]} : vector<8x128xf32> to vector<8x96xf32>
    %72 = arith.negf %71 : vector<8x96xf32>
    %73 = math.exp %72 : vector<8x96xf32>
    %cst_27 = arith.constant 1.000000e+00 : f32
    %74 = vector.broadcast %cst_27 : f32 to vector<8x96xf32>
    %75 = arith.addf %74, %73 : vector<8x96xf32>
    %76 = arith.divf %74, %75 : vector<8x96xf32>
    %77 = vector.extract_strided_slice %76 {offsets = [0, 0], sizes = [8, 32], strides = [1, 1]} : vector<8x96xf32> to vector<8x32xf32>
    %78 = vector.extract_strided_slice %76 {offsets = [0, 32], sizes = [8, 32], strides = [1, 1]} : vector<8x96xf32> to vector<8x32xf32>
    %79 = vector.extract_strided_slice %76 {offsets = [0, 64], sizes = [8, 32], strides = [1, 1]} : vector<8x96xf32> to vector<8x32xf32>
    %80 = vector.extract_strided_slice %70 {offsets = [0, 96], sizes = [8, 32], strides = [1, 1]} : vector<8x128xf32> to vector<8x32xf32>
    %81 = math.tanh %80 : vector<8x32xf32>
    %82 = arith.mulf %78, %59 : vector<8x32xf32>
    %83 = arith.mulf %77, %81 : vector<8x32xf32>
    %84 = arith.addf %82, %83 : vector<8x32xf32>
    %85 = math.tanh %84 : vector<8x32xf32>
    %86 = arith.mulf %79, %85 : vector<8x32xf32>
    %87 = arith.index_cast %65 : i32 to index
    %c0_28 = arith.constant 0 : index
    %88 = vector.load %arg10[%87, %c0_28] : memref<32x32xf32, #tpu.memory_space<vmem>>, vector<8x32xf32>
    tpu.vector_store %arg10[%87, %c0_28], %86 {strides = array<i32>} : memref<32x32xf32, #tpu.memory_space<vmem>>, vector<8x32xf32>,
    %c3_i32 = arith.constant 3 : i32
    %c8_i32_29 = arith.constant 8 : i32
    %89 = arith.muli %c3_i32, %c8_i32_29 : i32
    %90 = tpu.assume_multiple %89, 8 : i32
    %91 = arith.index_cast %90 : i32 to index
    %c0_30 = arith.constant 0 : index
    %92 = vector.load %arg9[%91, %c0_30] : memref<32x128xf32, #tpu.memory_space<vmem>>, vector<8x128xf32>
    %93 = arith.truncf %86 : vector<8x32xf32> to vector<8x32xbf16>
    %cst_31 = arith.constant dense<0.000000e+00> : vector<8x128xf32>
    %94 = tpu.matmul %93, %11, %cst_31 {dimension_numbers = #tpu.dot_dimension_numbers<[1], [0], [0], [1], [0, 0, 1, 1], [], []>} : vector<8x32xbf16>, vector<32x128xbf16>, vector<8x128xf32> -> vector<8x128xf32>
    %95 = arith.addf %92, %94 : vector<8x128xf32>
    %96 = vector.extract_strided_slice %95 {offsets = [0, 0], sizes = [8, 96], strides = [1, 1]} : vector<8x128xf32> to vector<8x96xf32>
    %97 = arith.negf %96 : vector<8x96xf32>
    %98 = math.exp %97 : vector<8x96xf32>
    %cst_32 = arith.constant 1.000000e+00 : f32
    %99 = vector.broadcast %cst_32 : f32 to vector<8x96xf32>
    %100 = arith.addf %99, %98 : vector<8x96xf32>
    %101 = arith.divf %99, %100 : vector<8x96xf32>
    %102 = vector.extract_strided_slice %101 {offsets = [0, 0], sizes = [8, 32], strides = [1, 1]} : vector<8x96xf32> to vector<8x32xf32>
    %103 = vector.extract_strided_slice %101 {offsets = [0, 32], sizes = [8, 32], strides = [1, 1]} : vector<8x96xf32> to vector<8x32xf32>
    %104 = vector.extract_strided_slice %101 {offsets = [0, 64], sizes = [8, 32], strides = [1, 1]} : vector<8x96xf32> to vector<8x32xf32>
    %105 = vector.extract_strided_slice %95 {offsets = [0, 96], sizes = [8, 32], strides = [1, 1]} : vector<8x128xf32> to vector<8x32xf32>
    %106 = math.tanh %105 : vector<8x32xf32>
    %107 = arith.mulf %103, %84 : vector<8x32xf32>
    %108 = arith.mulf %102, %106 : vector<8x32xf32>
    %109 = arith.addf %107, %108 : vector<8x32xf32>
    %110 = math.tanh %109 : vector<8x32xf32>
    %111 = arith.mulf %104, %110 : vector<8x32xf32>
    %112 = arith.index_cast %90 : i32 to index
    %c0_33 = arith.constant 0 : index
    %113 = vector.load %arg10[%112, %c0_33] : memref<32x32xf32, #tpu.memory_space<vmem>>, vector<8x32xf32>
    tpu.vector_store %arg10[%112, %c0_33], %111 {strides = array<i32>} : memref<32x32xf32, #tpu.memory_space<vmem>>, vector<8x32xf32>,
    %c4_i32 = arith.constant 4 : i32
    %c0_34 = arith.constant 0 : index
    %c0_35 = arith.constant 0 : index
    %114 = vector.load %arg11[%c0_34, %c0_35] : memref<8x32xf32, #tpu.memory_space<vmem>>, vector<8x32xf32>
    tpu.vector_store %arg11[%c0_34, %c0_35], %111 {strides = array<i32>} : memref<8x32xf32, #tpu.memory_space<vmem>>, vector<8x32xf32>,
    %c0_36 = arith.constant 0 : index
    %c0_37 = arith.constant 0 : index
    %115 = vector.load %arg12[%c0_36, %c0_37] : memref<8x32xf32, #tpu.memory_space<vmem>>, vector<8x32xf32>
    tpu.vector_store %arg12[%c0_36, %c0_37], %109 {strides = array<i32>} : memref<8x32xf32, #tpu.memory_space<vmem>>, vector<8x32xf32>,
    %c0_38 = arith.constant 0 : index
    %c0_39 = arith.constant 0 : index
    %116 = vector.load %arg10[%c0_38, %c0_39] : memref<32x32xf32, #tpu.memory_space<vmem>>, vector<32x32xf32>
    %c0_40 = arith.constant 0 : index
    %c0_41 = arith.constant 0 : index
    %117 = vector.load %arg8[%c0_40, %c0_41] : memref<32x32xf32, #tpu.memory_space<vmem>>, vector<32x32xf32>
    tpu.vector_store %arg8[%c0_40, %c0_41], %116 {strides = array<i32>} : memref<32x32xf32, #tpu.memory_space<vmem>>, vector<32x32xf32>,
    %118 = arith.truncf %116 : vector<32x32xf32> to vector<32x32xbf16>
    %c0_42 = arith.constant 0 : index
    %c0_43 = arith.constant 0 : index
    %119 = vector.load %arg5[%c0_42, %c0_43] : memref<32x8xbf16, #tpu.memory_space<vmem>>, vector<32x8xbf16>
    %cst_44 = arith.constant dense<0.000000e+00> : vector<32x8xf32>
    %120 = tpu.matmul %118, %119, %cst_44 {dimension_numbers = #tpu.dot_dimension_numbers<[1], [0], [0], [1], [0, 0, 1, 1], [], []>} : vector<32x32xbf16>, vector<32x8xbf16>, vector<32x8xf32> -> vector<32x8xf32>
    %c0_45 = arith.constant 0 : index
    %c0_46 = arith.constant 0 : index
    %121 = vector.load %arg6[%c0_45, %c0_46] : memref<1x8xf32, #tpu.memory_space<vmem>>, vector<1x8xf32>
    %122 = vector.broadcast %121 : vector<1x8xf32> to vector<32x8xf32>
    %123 = arith.addf %120, %122 : vector<32x8xf32>
    %c0_47 = arith.constant 0 : index
    %c0_48 = arith.constant 0 : index
    %124 = vector.load %arg7[%c0_47, %c0_48] : memref<32x8xf32, #tpu.memory_space<vmem>>, vector<32x8xf32>
    tpu.vector_store %arg7[%c0_47, %c0_48], %123 {strides = array<i32>} : memref<32x8xf32, #tpu.memory_space<vmem>>, vector<32x8xf32>,
    return
  }
  func.func @transform_0(%arg0: i32) -> (i32, i32) {
    %c0_i32 = arith.constant 0 : i32
    %c0_i32_0 = arith.constant 0 : i32
    return %arg0, %c0_i32 : i32, i32
  }
  func.func @transform_1(%arg0: i32) -> (i32, i32) {
    %c0_i32 = arith.constant 0 : i32
    %c0_i32_0 = arith.constant 0 : i32
    %c0_i32_1 = arith.constant 0 : i32
    return %c0_i32, %c0_i32_0 : i32, i32
  }
  func.func @transform_2(%arg0: i32) -> (i32, i32) {
    %c0_i32 = arith.constant 0 : i32
    %c0_i32_0 = arith.constant 0 : i32
    %c0_i32_1 = arith.constant 0 : i32
    return %c0_i32, %c0_i32_0 : i32, i32
  }
  func.func @transform_3(%arg0: i32) -> (i32, i32) {
    %c0_i32 = arith.constant 0 : i32
    %c0_i32_0 = arith.constant 0 : i32
    %c0_i32_1 = arith.constant 0 : i32
    return %c0_i32, %c0_i32_0 : i32, i32
  }
  func.func @transform_4(%arg0: i32) -> (i32, i32) {
    %c0_i32 = arith.constant 0 : i32
    %c0_i32_0 = arith.constant 0 : i32
    %c0_i32_1 = arith.constant 0 : i32
    return %c0_i32, %c0_i32_0 : i32, i32
  }
  func.func @transform_5(%arg0: i32) -> (i32, i32) {
    %c0_i32 = arith.constant 0 : i32
    %c0_i32_0 = arith.constant 0 : i32
    %c0_i32_1 = arith.constant 0 : i32
    return %c0_i32, %c0_i32_0 : i32, i32
  }
  func.func @transform_6(%arg0: i32) -> (i32, i32) {
    %c0_i32 = arith.constant 0 : i32
    %c0_i32_0 = arith.constant 0 : i32
    return %arg0, %c0_i32 : i32, i32
  }
  func.func @transform_7(%arg0: i32) -> (i32, i32) {
    %c0_i32 = arith.constant 0 : i32
    %c0_i32_0 = arith.constant 0 : i32
    return %arg0, %c0_i32 : i32, i32
  }
}

</mosaic_0001>

<bundles_post_ra>
// kernel: tpu_custom_call.1
= control target key start
LH: loop header
LB: loop body
LE: loop exit
PB: predicated region body
PF: predicated region fallthrough
CT: control target
= control target key end

     0   :  { %s1115_s24 = smov 0   ;;  %s1248_s0 = inlined_call_operand.vmem [shape: f32[64,16], index: 0, kind: input, shape index: {}]   ;;  %s1249_s1 = inlined_call_operand.vmem [shape: bf16[16,128], index: 1, kind: input, shape index: {}]   ;;  %s1250_s2 = inlined_call_operand.vmem [shape: bf16[32,128], index: 2, kind: input, shape index: {}]   ;;  %s1251_s3 = inlined_call_operand.vmem [shape: f32[1,128], index: 3, kind: input, shape index: {}]   ;;  %s1252_s4 = inlined_call_operand.vmem [shape: bf16[32,8], index: 4, kind: input, shape index: {}]   ;;  %s1253_s5 = inlined_call_operand.vmem [shape: f32[1,8], index: 5, kind: input, shape index: {}]   ;;  %s1254_s6 = inlined_call_operand.vmem [shape: f32[64,8], index: 6, kind: output, shape index: {0}]   ;;  %s1255_s7 = inlined_call_operand.vmem [shape: f32[64,32], index: 7, kind: output, shape index: {1}]  }
   0x1 LB: > { %s912_s25 = sadd.s32 4294967295, %s1067_s24   ;;  %p916_p0 = scmp.ge.s32.totalorder %s1067_s24, 1  ;;  %s1067_s24 = sphi %s1115_s24, %s18_s24  }
   0x2   : > { %p241_p1 = scmp.lt.s32.totalorder %s1067_s24, 3 }
   0x4   : > { %p242_p2 = pnand %p916_p0, %p241_p1 }
   0x5   : > { %s917_s26 = sshll.u32 (!%p242_p2), %s912_s25, 2  ;;  %p923_p4 = scmp.ne.s32.totalorder (!%p242_p2), %s912_s25, 0 }
   0x6   : > { %245 = sbr.rel (%p242_p2) target bundleno = 3071 (0xbff), region = 44  ;;  %p279_p3 = scmp.lt.s32.totalorder (!%p242_p2), %s917_s26, 7 }
   0xd   : > { %s1257_s26 = smov (!%p279_p3, %s917_s26), 7  ;;  %300 = sbr.rel (%p923_p4) target bundleno = 20 (0x14), region = 48 }
   0xe   : > { %s918_s27 = sshll.u32 %s1257_s26, 3  ;;  %vm301_vm0 = vcmask (!%p923_p4), 261120   ;;  %v1069_v0 = vmov (!%p923_p4), 0.0  }
   0xf   : > { %s282_s30 = scalar_lea.vmem %s1248_s0, %s918_s27  ;;  %s1129_s10 = scalar_lea.vmem %s1254_s6, %s918_s27  ;;  %302 = vst.msk [vmem:[#allocation4] sm:$0xff] (!%p923_p4), %vm301_vm0, %v1069_v0  ;;  %303 = vst.msk [vmem:[#allocation5] sm:$0xff] (!%p923_p4), %vm301_vm0, %v1069_v0 }
  0x10   : > { %s1134_s13 = scalar_lea.vmem %s1255_s7, %s918_s27 }
  0x14 PF: > { %v1024_v1 = vld [vmem:[%s1249_s1] sm:$0xff]   ;;  %v1070_v2 = vmov 0.0   ;;  %v305_v5 = vld [vmem:[%s282_s30 + $0x8] sm:$0xff]  ;;  %vm325_vm1 = vcmask 130048   ;;  %v306_v6 = vld [vmem:[%s282_s30 + $0x10] sm:$0xff]  ;;  %vm1071_vm2 = vmmov 0  }
  0x15   : > { %970 = vmatprep.subr.bf16.mxu1 %v1070_v2  ;;  %v1143_v3 = vld [vmem:[%s1250_s2] sm:$0xff]   ;;  %964 = vmatprep.subr.bf16.mxu0 %v1024_v1  ;;  %v307_v8 = vld [vmem:[%s282_s30 + $0x18] sm:$0xff]  ;;  %v1150_v10 = vld [vmem:[%s1250_s2 + $0x8] sm:$0xff]   ;;  %vm405_vm3 = vcmask 261120   ;;  %s1072_s22 = smov 32   ;;  %s1073_s23 = smov 64  }
  0x16   : > { %v304_v4 = vld [vmem:[%s282_s30] sm:$0xff]  ;;  %971 = vmatpush3.bf16.msra.mxu1 %v1143_v3  ;;  %965 = vmatpush3.bf16.msra.mxu0 %v1024_v1  ;;  %v309_v9 = vpack.c.bf16 %v307_v8, %v306_v6  ;;  %v390_v28 = vld [vmem:[#allocation5] sm:$0xff]  ;;  %s1074_s25 = smov 96   ;;  %vm817_vm4 = vcmask 64512  }
  0x17   : > { %v308_v7 = vpack.c.bf16 %v305_v5, %v304_v4  ;;  %972 = vmatprep.subr.bf16.mxu1 %v1070_v2  ;;  %974 = vmatprep.mubr.msk.bf16.mxu1 %vm1071_vm2, %v1070_v2  ;;  %v389_v11 = vld [vmem:[#allocation4] sm:$0xff] }
  0x18   : > { %978 = vmatprep.subr.bf16.mxu0 %v1070_v2  ;;  %v392_v12 = vpack.c.bf16 %v389_v11, %v389_v11  ;;  %v924_v13 = vld [vmem:[%s1251_s3] ss:$0 sm:$0xff] }
  0x19   : > { %966 = vmatprep.mubr.msk.bf16.mxu0 %vm325_vm1, %v308_v7 }
  0x1a   : > { %967 = vmatmul.mubr.msk.bf16.vlgmr.msra.gmra.mrb[0].mxu0 %vm325_vm1, %v309_v9  ;;  %973 = vmatpush3.bf16.msra.mxu1 %v1150_v10 }
  0x1b   : > { %979 = vmatpush3.bf16.msra.mxu0 %v1143_v3  ;;  %982 = vmatprep.mubr.msk.bf16.mxu0 %vm1071_vm2, %v1070_v2 }
  0x1c   : > { %980 = vmatprep.subr.bf16.mxu0 %v1070_v2  ;;  %986 = vmatprep.subr.bf16.mxu1 %v1070_v2 }
  0x1d   : > { %975 = vmatmul.mubr.msk.bf16.vlgmr.msra.gmra.mrb[0].mxu1 %vm405_vm3, %v392_v12 }
  0x1e   : > { %987 = vmatpush3.bf16.msra.mxu1 %v1143_v3  ;;  %990 = vmatprep.mubr.msk.bf16.mxu1 %vm1071_vm2, %v1070_v2 }
  0x1f   : > { %981 = vmatpush3.bf16.msra.mxu0 %v1150_v10  ;;  %988 = vmatprep.subr.bf16.mxu1 %v1070_v2 }
  0x20   : > { %994 = vmatprep.subr.bf16.mxu0 %v1070_v2 }
  0x22   : > { %989 = vmatpush3.bf16.msra.mxu1 %v1150_v10 }
  0xed   : > { %v968_v14 = vpop.f32.mrb[0].mxu0 }
  0xee   : > { %v1172_v15 = vadd.f32 %v968_v14, %v924_v13  ;;  %v366_v16 = vpop.f32.mrb[1].mxu0 }
  0xef   : > { %v367_v17 = vadd.f32 %v924_v13, %v366_v16  ;;  %v969_v18 = vpop.f32.mrb[2].mxu0 }
  0xf0   : > { %v1174_v19 = vadd.f32 %v969_v18, %v924_v13  ;;  %v369_v20 = vpop.f32.mrb[3].mxu0  ;;  %v443_v22 = vpop.f32.mrb[0].mxu1 }
  0xf1   : > { %v370_v21 = vadd.f32 %v924_v13, %v369_v20  ;;  %v449_v23 = vadd.f32 %v443_v22, %v367_v17  ;;  %v976_v24 = vpop.f32.mrb[1].mxu1 }
  0xf2   : > { %v446_v25 = vpop.f32.mrb[2].mxu1 }
  0xf3   : > { %1029 = vtanh.f32 %v449_v23  ;;  %v977_v26 = vpop.f32.mrb[3].mxu1  ;;  %v931_v29 = vmul.f32 -1.442695, %v449_v23 }
  0xf5   : > { %1031 = vpow2.f32 %v931_v29 }
  0xfd   : > { %v1030_v27 = vpop.eup %1029 }
  0xfe   : > { %463 = vrot.lane.b32.xlu0 %v1030_v27, %s1072_s22 }
  0xff   : > { %v1032_v30 = vpop.eup %1031 }
 0x100   : > { %v453_v31 = vadd.f32 1.0, %v1032_v30 }
 0x102   : > { %458 = vrot.lane.b32.xlu0 %v390_v28, %s1072_s22  ;;  %1033 = vrcp.f32 %v453_v31 }
 0x10c   : > { %v1034_v32 = vpop.eup %1033 }
 0x170   : > { %v464_v33 = vpop.permute.xlu0 %463 }
 0x171   : > { %v466_v34 = vmul.f32 %v1034_v32, %v464_v33 }
 0x173   : > { %468 = vrot.lane.b32.xlu1 %v466_v34, %s1072_s22 }
 0x174   : > { %v459_v35 = vpop.permute.xlu0 %458 }
 0x175   : > { %v461_v36 = vmul.f32 %v1034_v32, %v459_v35 }
 0x1e5   : > { %v469_v37 = vpop.permute.xlu1 %468 }
 0x1e6   : > { %v471_v38 = vadd.f32 %v469_v37, %v461_v36 }
 0x1e8   : > { %1035 = vtanh.f32 %v471_v38 }
 0x1f2   : > { %v1036_v39 = vpop.eup %1035 }
 0x1f3   : > { %474 = vrot.lane.b32.xlu1 %v1036_v39, %s1072_s22 }
 0x265   : > { %v475_v40 = vpop.permute.xlu1 %474 }
 0x266   : > { %v1180_v41 = vmul.f32 %v1034_v32, %v475_v40  ;;  %v1027_v40 = vld [vmem:[%s1252_s4] sm:$0xff]  }
 0x267   : > { %1002 = vmatprep.subr.bf16.mxu1 %v1027_v40 }
 0x268   : > { %v485_v42 = vpack.c.bf16 %v1180_v41, %v1180_v41 }
 0x26a   : > { %487 = vrot.lane.b32.xlu0 %v485_v42, %s1073_s23 }
 0x2dc   : > { %v488_v43 = vpop.permute.xlu0 %487 }
 0x2dd   : > { %983 = vmatmul.mubr.msk.bf16.vlgmr.msra.gmra.mrb[4].mxu0 %vm405_vm3, %v488_v43 }
 0x2de   : > { %995 = vmatpush3.bf16.msra.mxu0 %v1143_v3  ;;  %998 = vmatprep.mubr.msk.bf16.mxu0 %vm1071_vm2, %v1070_v2 }
 0x2df   : > { %996 = vmatprep.subr.bf16.mxu0 %v1070_v2 }
 0x2e2   : > { %997 = vmatpush3.bf16.msra.mxu0 %v1150_v10 }
 0x3b0   : > { %v526_v44 = vpop.f32.mrb[4].mxu0 }
 0x3b1   : > { %v532_v45 = vadd.f32 %v526_v44, %v370_v21  ;;  %v984_v46 = vpop.f32.mrb[5].mxu0 }
 0x3b2   : > { %v529_v47 = vpop.f32.mrb[6].mxu0 }
 0x3b3   : > { %1037 = vtanh.f32 %v532_v45  ;;  %v985_v48 = vpop.f32.mrb[7].mxu0  ;;  %v933_v50 = vmul.f32 -1.442695, %v532_v45 }
 0x3b5   : > { %1039 = vpow2.f32 %v933_v50 }
 0x3bd   : > { %v1038_v49 = vpop.eup %1037 }
 0x3be   : > { %542 = vrot.lane.b32.xlu1 %v1038_v49, %s1072_s22 }
 0x3bf   : > { %v1040_v51 = vpop.eup %1039 }
 0x3c0   : > { %v536_v52 = vadd.f32 1.0, %v1040_v51  ;;  %v938_v51 = vld [vmem:[%s1253_s5] ss:$0 sm:$0xff] }
 0x3c2   : > { %1041 = vrcp.f32 %v536_v52 }
 0x3cc   : > { %v1042_v53 = vpop.eup %1041 }
 0x3cd   : > { %v540_v56 = vmul.f32 %v1042_v53, %v471_v38 }
 0x430   : > { %v543_v54 = vpop.permute.xlu1 %542 }
 0x431   : > { %v545_v55 = vmul.f32 %v1042_v53, %v543_v54 }
 0x433   : > { %547 = vrot.lane.b32.xlu0 %v545_v55, %s1072_s22 }
 0x4a5   : > { %v548_v57 = vpop.permute.xlu0 %547 }
 0x4a6   : > { %v550_v58 = vadd.f32 %v548_v57, %v540_v56 }
 0x4a8   : > { %1043 = vtanh.f32 %v550_v58 }
 0x4b2   : > { %v1044_v59 = vpop.eup %1043 }
 0x4b3   : > { %553 = vrot.lane.b32.xlu1 %v1044_v59, %s1072_s22 }
 0x525   : > { %v554_v60 = vpop.permute.xlu1 %553 }
 0x526   : > { %v1194_v61 = vmul.f32 %v1042_v53, %v554_v60 }
 0x528   : > { %v565_v62 = vpack.c.bf16 %v1194_v61, %v1194_v61 }
 0x52a   : > { %567 = vrot.lane.b32.xlu0 %v565_v62, %s1073_s23 }
 0x59c   : > { %v568_v63 = vpop.permute.xlu0 %567 }
 0x59d   : > { %991 = vmatmul.mubr.msk.bf16.vlgmr.msra.gmra.mrb[4].mxu1 %vm405_vm3, %v568_v63 }
 0x59e   : > { %1003 = vmatpush3.bf16.msra.mxu1 %v1027_v40 }
 0x670   : > { %v606_v0 = vpop.f32.mrb[4].mxu1 }
 0x671   : > { %v612_v1 = vadd.f32 %v606_v0, %v1172_v15  ;;  %v992_v2 = vpop.f32.mrb[5].mxu1 }
 0x672   : > { %v609_v3 = vpop.f32.mrb[6].mxu1 }
 0x673   : > { %1045 = vtanh.f32 %v612_v1  ;;  %v993_v4 = vpop.f32.mrb[7].mxu1  ;;  %v935_v6 = vmul.f32 -1.442695, %v612_v1 }
 0x675   : > { %1047 = vpow2.f32 %v935_v6 }
 0x67d   : > { %v1046_v5 = vpop.eup %1045 }
 0x67e   : > { %622 = vrot.lane.b32.xlu1 %v1046_v5, %s1072_s22 }
 0x67f   : > { %v1048_v7 = vpop.eup %1047 }
 0x680   : > { %v616_v8 = vadd.f32 1.0, %v1048_v7 }
 0x682   : > { %1049 = vrcp.f32 %v616_v8 }
 0x68c   : > { %v1050_v9 = vpop.eup %1049 }
 0x68d   : > { %v620_v12 = vmul.f32 %v1050_v9, %v550_v58 }
 0x6f0   : > { %v623_v10 = vpop.permute.xlu1 %622 }
 0x6f1   : > { %v625_v11 = vmul.f32 %v1050_v9, %v623_v10 }
 0x6f3   : > { %627 = vrot.lane.b32.xlu0 %v625_v11, %s1072_s22 }
 0x765   : > { %v628_v13 = vpop.permute.xlu0 %627 }
 0x766   : > { %v630_v14 = vadd.f32 %v628_v13, %v620_v12 }
 0x768   : > { %1051 = vtanh.f32 %v630_v14 }
 0x772   : > { %v1052_v15 = vpop.eup %1051 }
 0x773   : > { %633 = vrot.lane.b32.xlu1 %v1052_v15, %s1072_s22 }
 0x7e5   : > { %v634_v16 = vpop.permute.xlu1 %633 }
 0x7e6   : > { %v636_v17 = vmul.f32 %v1050_v9, %v634_v16 }
 0x7e8   : > { %v645_v18 = vpack.c.bf16 %v636_v17, %v636_v17 }
 0x7ea   : > { %647 = vrot.lane.b32.xlu0 %v645_v18, %s1073_s23 }
 0x85c   : > { %v648_v20 = vpop.permute.xlu0 %647 }
 0x85d   : > { %999 = vmatmul.mubr.msk.bf16.vlgmr.msra.gmra.mrb[8].mxu0 %vm405_vm3, %v648_v20 }
 0x930   : > { %v686_v21 = vpop.f32.mrb[8].mxu0 }
 0x931   : > { %v692_v22 = vadd.f32 %v686_v21, %v1174_v19  ;;  %v1000_v23 = vpop.f32.mrb[9].mxu0 }
 0x932   : > { %v689_v24 = vpop.f32.mrb[10].mxu0 }
 0x933   : > { %1053 = vtanh.f32 %v692_v22  ;;  %v1001_v25 = vpop.f32.mrb[11].mxu0  ;;  %v937_v27 = vmul.f32 -1.442695, %v692_v22 }
 0x935   : > { %1055 = vpow2.f32 %v937_v27 }
 0x93d   : > { %v1054_v26 = vpop.eup %1053 }
 0x93e   : > { %702 = vrot.lane.b32.xlu1 %v1054_v26, %s1072_s22 }
 0x93f   : > { %v1056_v28 = vpop.eup %1055 }
 0x940   : > { %v696_v29 = vadd.f32 1.0, %v1056_v28 }
 0x942   : > { %1057 = vrcp.f32 %v696_v29 }
 0x94c   : > { %v1058_v30 = vpop.eup %1057 }
 0x94d   : > { %v700_v19 = vmul.f32 %v1058_v30, %v630_v14 }
 0x9b0   : > { %v703_v31 = vpop.permute.xlu1 %702 }
 0x9b1   : > { %v705_v32 = vmul.f32 %v1058_v30, %v703_v31 }
 0x9b3   : > { %707 = vrot.lane.b32.xlu0 %v705_v32, %s1072_s22 }
 0x9b7   : > { %479 = vrot.lane.b32.xlu0 %v1180_v41, %s1073_s23  ;;  %v1028_v41 = vld [vmem:[%s1252_s4 + $0x8] sm:$0xff]  }
 0x9b8   : > { %1004 = vmatprep.subr.bf16.mxu1 %v1028_v41 }
 0x9b9   : > { %1005 = vmatpush3.bf16.msra.mxu1 %v1028_v41 }
 0x9bb   : > { %638 = vrot.lane.b32.xlu0 %v636_v17, %s1073_s23 }
 0xa25   : > { %v708_v33 = vpop.permute.xlu0 %707 }
 0xa26   : > { %v710_v34 = vadd.f32 %v708_v33, %v700_v19 }
 0xa28   : > { %1059 = vtanh.f32 %v710_v34  ;;  %725 = vrot.lane.b32.xlu0 %v710_v34, %s1074_s25 }
 0xa29   : > { %v480_v35 = vpop.permute.xlu0 %479 }
 0xa2a   : > { %482 = vst.msk [vmem:[#allocation3] sm:$0xff] %vm405_vm3, %v480_v35 }
 0xa2d   : > { %v639_v36 = vpop.permute.xlu0 %638 }
 0xa2e   : > { %642 = vst.msk [vmem:[#allocation3 + $0x10] sm:$0xff] %vm405_vm3, %v639_v36 }
 0xa31   : > { %v729_v37 = vld [vmem:[#allocation3] sm:$0xff] }
 0xa32   : > { %v1060_v38 = vpop.eup %1059  ;;  %733 = vst.msk [vmem:[%s1134_s13] sm:$0xff] %vm405_vm3, %v729_v37 }
 0xa33   : > { %713 = vrot.lane.b32.xlu1 %v1060_v38, %s1072_s22 }
 0xa35   : > { %v731_v46 = vld [vmem:[#allocation3 + $0x10] sm:$0xff] }
 0xa36   : > { %735 = vst.msk [vmem:[%s1134_s13 + $0x10] sm:$0xff] %vm405_vm3, %v731_v46 }
 0xa37   : > { %558 = vrot.lane.b32.xlu1 %v1194_v61, %s1073_s23 }
 0xa9a   : > { %v726_v39 = vpop.permute.xlu0 %725 }
 0xa9b   : > { %728 = vst.msk [vmem:[#allocation5] sm:$0xff] %vm405_vm3, %v726_v39 }
 0xaa5   : > { %v714_v42 = vpop.permute.xlu1 %713 }
 0xaa6   : > { %v716_v43 = vmul.f32 %v1058_v30, %v714_v42 }
 0xaa8   : > { %718 = vrot.lane.b32.xlu1 %v716_v43, %s1073_s23 }
 0xaa9   : > { %v559_v44 = vpop.permute.xlu1 %558 }
 0xaaa   : > { %562 = vst.msk [vmem:[#allocation3 + $0x8] sm:$0xff] %vm405_vm3, %v559_v44 }
 0xab1   : > { %v730_v45 = vld [vmem:[#allocation3 + $0x8] sm:$0xff] }
 0xab2   : > { %734 = vst.msk [vmem:[%s1134_s13 + $0x8] sm:$0xff] %vm405_vm3, %v730_v45  ;;  %v737_v47 = vpack.c.bf16 %v730_v45, %v729_v37 }
 0xab4   : > { %1006 = vmatprep.mubr.msk.bf16.mxu1 %vm405_vm3, %v737_v47 }
 0xb1a   : > { %v719_v48 = vpop.permute.xlu1 %718 }
 0xb1b   : > { %722 = vst.msk [vmem:[#allocation3 + $0x18] sm:$0xff] %vm405_vm3, %v719_v48  ;;  %723 = vst.msk [vmem:[#allocation4] sm:$0xff] %vm405_vm3, %v719_v48 }
 0xb22   : > { %v732_v49 = vld [vmem:[#allocation3 + $0x18] sm:$0xff] }
 0xb23   : > { %736 = vst.msk [vmem:[%s1134_s13 + $0x18] sm:$0xff] %vm405_vm3, %v732_v49  ;;  %v738_v50 = vpack.c.bf16 %v732_v49, %v731_v46 }
 0xb25   : > { %1007 = vmatmul.mubr.msk.bf16.vlgmr.msra.gmra.mrb[8].mxu1 %vm405_vm3, %v738_v50 }
 0xbf8   : > { %v1008_v52 = vpop.f32.mrb[8].mxu1 }
 0xbf9   : > { %v802_v53 = vpop.f32.mrb[9].mxu1  ;;  %v811_v58 = vadd.f32 %v1008_v52, %v938_v51 }
 0xbfa   : > { %v803_v54 = vadd.f32 %v938_v51, %v802_v53  ;;  %v1009_v55 = vpop.f32.mrb[10].mxu1 }
 0xbfb   : > { %v805_v56 = vpop.f32.mrb[11].mxu1  ;;  %v814_v59 = vadd.f32 %v1009_v55, %v938_v51  ;;  %820 = vst.msk [vmem:[%s1129_s10 + $0x10] sm:$0xff] %vm817_vm4, %v811_v58 }
 0xbfc   : > { %818 = vst.msk [vmem:[%s1129_s10] sm:$0xff] %vm817_vm4, %v803_v54  ;;  %v806_v57 = vadd.f32 %v938_v51, %v805_v56 }
 0xbfd   : > { %821 = vst.msk [vmem:[%s1129_s10 + $0x18] sm:$0xff] %vm817_vm4, %v814_v59 }
 0xbfe   : > { %819 = vst.msk [vmem:[%s1129_s10 + $0x8] sm:$0xff] %vm817_vm4, %v806_v57 }
 0xbff PF: > { %s18_s24 = sadd.s32 1, %s1067_s24  }
 0xc00   : > { %p15_p5 = scmp.ge.s32.totalorder %s18_s24, 4  }
 0xc02   :  { %17 = sbr.rel (!%p15_p5) target bundleno = 1 (0x1), region = 96 }

</bundles_post_ra>
